<compile_context>
chip_gen: v7x
topology: tpu7x:2x2x1
jax: 0.10.0
libtpu: 0.0.40
codegen_flags: <defaults>
</compile_context>

<pallas_src>
import math
import jax
import jax.numpy as jnp
from jax.experimental import pallas as pl
from jax.experimental.pallas import tpu as pltpu


def _ensemble_fused_kernel(x_ref, w1_ref, b1_ref, w2_ref, b2_ref, w3_ref, b3_ref,
                           o_ref):
    """One batch tile: 3 matmuls + 2 tanh, ensemble mean folded into layer 3.

    x_ref  : (TB, D)
    w1_ref : (D, P1)    b1_ref : (1, P1)
    w2_ref : (P1, P2)   b2_ref : (1, P2)
    w3_ref : (P2, PO)   b3_ref : (1, PO)   (already scaled by 1/N and mean-folded)
    o_ref  : (TB, PO)   lane-dense mean output (only [:, :O] is meaningful)
    """
    x = x_ref[...]
    h = jnp.tanh(jnp.dot(x, w1_ref[...], preferred_element_type=jnp.float32)
                 + b1_ref[...])
    h = jnp.tanh(jnp.dot(h, w2_ref[...], preferred_element_type=jnp.float32)
                 + b2_ref[...])
    y = jnp.dot(h, w3_ref[...], preferred_element_type=jnp.float32) + b3_ref[...]
    o_ref[...] = y.astype(o_ref.dtype)


def _round_up(n, m):
    return ((n + m - 1) // m) * m


def _block_diag(blocks):
    """blocks: (N, r, c) -> (N*r, N*c) block-diagonal matrix (host-side packing)."""
    n, r, c = blocks.shape
    out = jnp.zeros((n * r, n * c), blocks.dtype)
    for i in range(n):
        out = out.at[i * r:(i + 1) * r, i * c:(i + 1) * c].set(blocks[i])
    return out


def pack_params(params, lane_multiple=128):
    """One-time host-side packing of stacked ensemble params into fused,
    lane-padded matrices.  The ensemble mean is folded into layer 3."""
    W1, b1 = params["W1"], params["b1"]          # (N, D, H0), (N, 1, H0)
    W2, b2 = params["W2"], params["b2"]          # (N, H0, H1), (N, 1, H1)
    W3, b3 = params["W3"], params["b3"]          # (N, H1, O),  (N, 1, O)
    N, D, H0 = W1.shape
    H1 = W2.shape[2]
    O = W3.shape[2]

    P1 = _round_up(N * H0, lane_multiple)        # fused hidden widths padded to
    P2 = _round_up(N * H1, lane_multiple)        # lane multiples (e.g. 96 -> 128)
    PO = _round_up(O, lane_multiple)             # lane-dense output width

    # Layer 1: concatenate member blocks along the lane axis.
    W1c = W1.transpose(1, 0, 2).reshape(D, N * H0)
    b1c = b1.reshape(1, N * H0)
    # Layer 2: block-diagonal so members stay independent.
    W2bd = _block_diag(W2)                       # (N*H0, N*H1)
    b2c = b2.reshape(1, N * H1)
    # Layer 3: mean folded in (linear layer, so mean commutes into the weights):
    #   rows [i*H1:(i+1)*H1] = W3[i] / N ;  bias = mean_i b3[i]
    W3f = W3.reshape(N * H1, O) * (1.0 / N)      # (N*H1, O)
    b3f = b3.mean(axis=0)                        # (1, O)

    W1c = jnp.pad(W1c, ((0, 0), (0, P1 - N * H0)))
    b1c = jnp.pad(b1c, ((0, 0), (0, P1 - N * H0)))
    W2bd = jnp.pad(W2bd, ((0, P1 - N * H0), (0, P2 - N * H1)))
    b2c = jnp.pad(b2c, ((0, 0), (0, P2 - N * H1)))
    W3f = jnp.pad(W3f, ((0, P2 - N * H1), (0, PO - O)))
    b3f = jnp.pad(b3f, ((0, 0), (0, PO - O)))

    return dict(W1c=W1c, b1c=b1c, W2bd=W2bd, b2c=b2c, W3f=W3f, b3f=b3f,
                num_net=N, hidden0=H0, hidden1=H1, output_dim=O)


def _choose_tile_batch(B):
    """Large tiles amortize the ~0.35us per-grid-step overhead; multiple of 8."""
    return min(512, _round_up(B, 8))


def ensemble_std_forward(x, packed):
    """Pallas forward pass of EnsembleStd (ensemble-mean output).

    x      : (B, input_dim) float32
    packed : output of pack_params
    returns: (B,) if output_dim == 1 else (B, output_dim)  (torch.squeeze(-1))
    """
    W1c, b1c = packed["W1c"], packed["b1c"]
    W2bd, b2c = packed["W2bd"], packed["b2c"]
    W3f, b3f = packed["W3f"], packed["b3f"]
    N, O = packed["num_net"], packed["output_dim"]
    H0, H1 = packed["hidden0"], packed["hidden1"]
    B, D = x.shape
    P1 = W1c.shape[1]
    P2 = W2bd.shape[1]
    PO = W3f.shape[1]

    # Batch tiling: pad B up to a multiple of TB; padded rows are discarded.
    TB = _choose_tile_batch(B)
    B_pad = _round_up(B, TB)
    if B_pad != B:
        x = jnp.pad(x, ((0, B_pad - B), (0, 0)))
    nb = pl.cdiv(B_pad, TB)

    cost = pl.CostEstimate(
        flops=2 * B_pad * (D * P1 + P1 * P2 + P2 * PO),
        transcendentals=B_pad * (N * H0 + N * H1),     # only un-padded lanes
        bytes_accessed=4 * (B_pad * D + D * P1 + P1 + P1 * P2 + P2
                            + P2 * PO + PO + B_pad * PO),
    )

    out_padded = pl.pallas_call(
        _ensemble_fused_kernel,
        out_shape=jax.ShapeDtypeStruct((B_pad, PO), jnp.float32),
        grid_spec=pltpu.PrefetchScalarGridSpec(
            num_scalar_prefetch=0,
            grid=(nb,),
            in_specs=[
                # x: pipelined batch tiles.
                pl.BlockSpec((TB, D), lambda i: (i, 0)),
                # Weights/biases: constant index_map -> fetched once, VMEM-resident.
                pl.BlockSpec((D, P1), lambda i: (0, 0)),
                pl.BlockSpec((1, P1), lambda i: (0, 0)),
                pl.BlockSpec((P1, P2), lambda i: (0, 0)),
                pl.BlockSpec((1, P2), lambda i: (0, 0)),
                pl.BlockSpec((P2, PO), lambda i: (0, 0)),
                pl.BlockSpec((1, PO), lambda i: (0, 0)),
            ],
            out_specs=pl.BlockSpec((TB, PO), lambda i: (i, 0)),
        ),
        compiler_params=pltpu.CompilerParams(
            dimension_semantics=("parallel",),
        ),
        cost_estimate=cost,
    )(x, W1c, b1c, W2bd, b2c, W3f, b3f)

    out = out_padded[:B, :O]
    if O == 1:
        out = out[:, 0]
    return out


def make_params(key, num_net, input_dim, hidden_dim, output_dim):
    """Deterministic init mimicking nn.Linear default (U(-1/sqrt(fan_in), +))."""
    dims = [(input_dim, hidden_dim[0]),
            (hidden_dim[0], hidden_dim[1]),
            (hidden_dim[1], output_dim)]
    params = {}
    keys = jax.random.split(key, 6 * num_net)
    kidx = 0
    for layer_idx, (fan_in, fan_out) in enumerate(dims, start=1):
        bound = 1.0 / math.sqrt(fan_in)
        Ws, bs = [], []
        for _ in range(num_net):
            Ws.append(jax.random.uniform(keys[kidx], (fan_in, fan_out),
                                         jnp.float32, -bound, bound))
            kidx += 1
            bs.append(jax.random.uniform(keys[kidx], (1, fan_out),
                                         jnp.float32, -bound, bound))
            kidx += 1
        params[f"W{layer_idx}"] = jnp.stack(Ws)      # (N, fan_in, fan_out)
        params[f"b{layer_idx}"] = jnp.stack(bs)      # (N, 1, fan_out)
    return params


def reference_forward(x, params):
    """Pure-JAX reference replicating the PyTorch module's forward()."""
    outs = []
    N = params["W1"].shape[0]
    for i in range(N):
        h = jnp.tanh(x @ params["W1"][i] + params["b1"][i])
        h = jnp.tanh(h @ params["W2"][i] + params["b2"][i])
        outs.append(h @ params["W3"][i] + params["b3"][i])
    out = jnp.stack(outs).mean(axis=0)
    return jnp.squeeze(out, -1) if out.shape[-1] == 1 else out


# TODO(synk): forward_idx (single-member evaluation) is not implemented in the
# fused/mean-folded kernel path; it would need the un-folded per-member weights.

if __name__ == "__main__":
    num_net = 3
    input_dim = 16
    hidden_dim = [32, 32]
    output_dim = 1
    batch = 8

    key = jax.random.PRNGKey(0)
    kx, kp = jax.random.split(key)
    x = jax.random.normal(kx, (batch, input_dim), jnp.float32)
    params = make_params(kp, num_net, input_dim, hidden_dim, output_dim)
    packed = pack_params(params)

    out = ensemble_std_forward(x, packed)
    out = jax.block_until_ready(out)

    ref = reference_forward(x, params)
    assert out.shape == ref.shape == (batch,)
    assert jnp.allclose(out, ref, atol=1e-5, rtol=1e-5)

    print("KERNEL_OK")
</pallas_src>

<mosaic_0001>
module attributes {stable_mosaic.version = 11 : i64} {
  func.func @_ensemble_fused_kernel(%arg0: i32, %arg1: memref<8x16xf32, #tpu.memory_space<vmem>>, %arg2: memref<16x128xf32, #tpu.memory_space<vmem>>, %arg3: memref<1x128xf32, #tpu.memory_space<vmem>>, %arg4: memref<128x128xf32, #tpu.memory_space<vmem>>, %arg5: memref<1x128xf32, #tpu.memory_space<vmem>>, %arg6: memref<128x128xf32, #tpu.memory_space<vmem>>, %arg7: memref<1x128xf32, #tpu.memory_space<vmem>>, %arg8: memref<8x128xf32, #tpu.memory_space<vmem>>) attributes {dimension_semantics = [#tpu.dimension_semantics<parallel>], iteration_bounds = array<i64: 1>, scalar_prefetch = 0 : i64, scratch_operands = 0 : i64, tpu.core_type = #tpu.core_type<tc>, window_params = [{transform_indices = @transform_0, window_bounds = array<i64: 8, 16>}, {pipeline_mode = #tpu.pipeline_mode<synchronous>, transform_indices = @transform_1, window_bounds = array<i64: 16, 128>}, {pipeline_mode = #tpu.pipeline_mode<synchronous>, transform_indices = @transform_2, window_bounds = array<i64: 1, 128>}, {pipeline_mode = #tpu.pipeline_mode<synchronous>, transform_indices = @transform_3, window_bounds = array<i64: 128, 128>}, {pipeline_mode = #tpu.pipeline_mode<synchronous>, transform_indices = @transform_4, window_bounds = array<i64: 1, 128>}, {pipeline_mode = #tpu.pipeline_mode<synchronous>, transform_indices = @transform_5, window_bounds = array<i64: 128, 128>}, {pipeline_mode = #tpu.pipeline_mode<synchronous>, transform_indices = @transform_6, window_bounds = array<i64: 1, 128>}, {transform_indices = @transform_7, window_bounds = array<i64: 8, 128>}]} {
    %c0 = arith.constant 0 : index
    %c0_0 = arith.constant 0 : index
    %0 = vector.load %arg1[%c0, %c0_0] : memref<8x16xf32, #tpu.memory_space<vmem>>, vector<8x16xf32>
    %c0_1 = arith.constant 0 : index
    %c0_2 = arith.constant 0 : index
    %1 = vector.load %arg2[%c0_1, %c0_2] : memref<16x128xf32, #tpu.memory_space<vmem>>, vector<16x128xf32>
    %cst = arith.constant dense<0.000000e+00> : vector<8x128xf32>
    %2 = tpu.matmul %0, %1, %cst {dimension_numbers = #tpu.dot_dimension_numbers<[1], [0], [0], [1], [0, 0, 1, 1], [], []>} : vector<8x16xf32>, vector<16x128xf32>, vector<8x128xf32> -> vector<8x128xf32>
    %c0_3 = arith.constant 0 : index
    %c0_4 = arith.constant 0 : index
    %3 = vector.load %arg3[%c0_3, %c0_4] : memref<1x128xf32, #tpu.memory_space<vmem>>, vector<1x128xf32>
    %4 = vector.broadcast %3 : vector<1x128xf32> to vector<8x128xf32>
    %5 = arith.addf %2, %4 : vector<8x128xf32>
    %6 = math.tanh %5 : vector<8x128xf32>
    %c0_5 = arith.constant 0 : index
    %c0_6 = arith.constant 0 : index
    %7 = vector.load %arg4[%c0_5, %c0_6] : memref<128x128xf32, #tpu.memory_space<vmem>>, vector<128x128xf32>
    %cst_7 = arith.constant dense<0.000000e+00> : vector<8x128xf32>
    %8 = tpu.matmul %6, %7, %cst_7 {dimension_numbers = #tpu.dot_dimension_numbers<[1], [0], [0], [1], [0, 0, 1, 1], [], []>} : vector<8x128xf32>, vector<128x128xf32>, vector<8x128xf32> -> vector<8x128xf32>
    %c0_8 = arith.constant 0 : index
    %c0_9 = arith.constant 0 : index
    %9 = vector.load %arg5[%c0_8, %c0_9] : memref<1x128xf32, #tpu.memory_space<vmem>>, vector<1x128xf32>
    %10 = vector.broadcast %9 : vector<1x128xf32> to vector<8x128xf32>
    %11 = arith.addf %8, %10 : vector<8x128xf32>
    %12 = math.tanh %11 : vector<8x128xf32>
    %c0_10 = arith.constant 0 : index
    %c0_11 = arith.constant 0 : index
    %13 = vector.load %arg6[%c0_10, %c0_11] : memref<128x128xf32, #tpu.memory_space<vmem>>, vector<128x128xf32>
    %cst_12 = arith.constant dense<0.000000e+00> : vector<8x128xf32>
    %14 = tpu.matmul %12, %13, %cst_12 {dimension_numbers = #tpu.dot_dimension_numbers<[1], [0], [0], [1], [0, 0, 1, 1], [], []>} : vector<8x128xf32>, vector<128x128xf32>, vector<8x128xf32> -> vector<8x128xf32>
    %c0_13 = arith.constant 0 : index
    %c0_14 = arith.constant 0 : index
    %15 = vector.load %arg7[%c0_13, %c0_14] : memref<1x128xf32, #tpu.memory_space<vmem>>, vector<1x128xf32>
    %16 = vector.broadcast %15 : vector<1x128xf32> to vector<8x128xf32>
    %17 = arith.addf %14, %16 : vector<8x128xf32>
    %c0_15 = arith.constant 0 : index
    %c0_16 = arith.constant 0 : index
    %18 = vector.load %arg8[%c0_15, %c0_16] : memref<8x128xf32, #tpu.memory_space<vmem>>, vector<8x128xf32>
    tpu.vector_store %arg8[%c0_15, %c0_16], %17 {strides = array<i32>} : memref<8x128xf32, #tpu.memory_space<vmem>>, vector<8x128xf32>,
    return
  }
  func.func @transform_0(%arg0: i32) -> (i32, i32) {
    %c0_i32 = arith.constant 0 : i32
    %c0_i32_0 = arith.constant 0 : i32
    return %arg0, %c0_i32 : i32, i32
  }
  func.func @transform_1(%arg0: i32) -> (i32, i32) {
    %c0_i32 = arith.constant 0 : i32
    %c0_i32_0 = arith.constant 0 : i32
    %c0_i32_1 = arith.constant 0 : i32
    return %c0_i32, %c0_i32_0 : i32, i32
  }
  func.func @transform_2(%arg0: i32) -> (i32, i32) {
    %c0_i32 = arith.constant 0 : i32
    %c0_i32_0 = arith.constant 0 : i32
    %c0_i32_1 = arith.constant 0 : i32
    return %c0_i32, %c0_i32_0 : i32, i32
  }
  func.func @transform_3(%arg0: i32) -> (i32, i32) {
    %c0_i32 = arith.constant 0 : i32
    %c0_i32_0 = arith.constant 0 : i32
    %c0_i32_1 = arith.constant 0 : i32
    return %c0_i32, %c0_i32_0 : i32, i32
  }
  func.func @transform_4(%arg0: i32) -> (i32, i32) {
    %c0_i32 = arith.constant 0 : i32
    %c0_i32_0 = arith.constant 0 : i32
    %c0_i32_1 = arith.constant 0 : i32
    return %c0_i32, %c0_i32_0 : i32, i32
  }
  func.func @transform_5(%arg0: i32) -> (i32, i32) {
    %c0_i32 = arith.constant 0 : i32
    %c0_i32_0 = arith.constant 0 : i32
    %c0_i32_1 = arith.constant 0 : i32
    return %c0_i32, %c0_i32_0 : i32, i32
  }
  func.func @transform_6(%arg0: i32) -> (i32, i32) {
    %c0_i32 = arith.constant 0 : i32
    %c0_i32_0 = arith.constant 0 : i32
    %c0_i32_1 = arith.constant 0 : i32
    return %c0_i32, %c0_i32_0 : i32, i32
  }
  func.func @transform_7(%arg0: i32) -> (i32, i32) {
    %c0_i32 = arith.constant 0 : i32
    %c0_i32_0 = arith.constant 0 : i32
    return %arg0, %c0_i32 : i32, i32
  }
}

</mosaic_0001>

<bundles_post_ra>
// kernel: tpu_custom_call.1
= control target key start
LH: loop header
LB: loop body
LE: loop exit
PB: predicated region body
PF: predicated region fallthrough
CT: control target
= control target key end

     0   :  { %12 = vsyncpa [#allocation3], 0  ;;  %s819_s0 = inlined_call_operand.hbm [shape: f32[8,16], index: 0, kind: input, shape index: {}]   ;;  %s820_s1 = inlined_call_operand.hbm [shape: f32[16,128], index: 1, kind: input, shape index: {}]   ;;  %s821_s2 = inlined_call_operand.vmem [shape: f32[1,128], index: 2, kind: input, shape index: {}]   ;;  %s822_s3 = inlined_call_operand.hbm [shape: f32[128,128], index: 3, kind: input, shape index: {}]   ;;  %s823_s4 = inlined_call_operand.vmem [shape: f32[1,128], index: 4, kind: input, shape index: {}]   ;;  %s824_s5 = inlined_call_operand.hbm [shape: f32[128,128], index: 5, kind: input, shape index: {}]   ;;  %s825_s6 = inlined_call_operand.vmem [shape: f32[1,128], index: 6, kind: input, shape index: {}]   ;;  %s826_s7 = inlined_call_operand.hbm [shape: f32[8,128], index: 7, kind: output, shape index: {}]  }
   0x1   :  { %13 = vsyncpa [#allocation6], 0 }
   0x2   :  { %14 = vsyncpa [#allocation9], 0 }
   0x3   :  { %15 = vsyncpa [#allocation4], 0  ;;  %s671_s24 = smov [#allocation5]   ;;  %s553_s28 = scalar_lea.hbm %s820_s1, 256 }
   0x4   :  { %s31_s25 = sshll.u32 %s671_s24, 4  ;;  %p554_p0 = scmp.ne.s32.totalorder %s820_s1, %s553_s28  ;;  %s32_s25 = int_to_ptr.vmem [resolvable:$true] %s31_s25 }
   0x5   :  { %p557_p1 = scmp.lt.u32.totalorder %s553_s28, %s820_s1 }
   0x7   :  { %p559_p2 = pnand %p557_p1, %p554_p0 }
   0x9   :  { %562 = shalt.err (!%p559_p2)
}
   0xa   :  { %s563_s10 = scalar_lea.vmem %s32_s25, 256  ;;  %p568_p4 = scmp.lt.s32.totalorder %s32_s25, %s32_s25 }
   0xb   :  { %p564_p3 = scmp.ne.s32.totalorder %s32_s25, %s563_s10  ;;  %p569_p5 = scmp.lt.s32.totalorder %s563_s10, %s563_s10 }
   0xd   :  { %p570_p6 = por %p569_p5, %p568_p4 }
   0xf   :  { %p571_p7 = pnand %p570_p6, %p564_p3 }
  0x11   :  { %574 = shalt.err (!%p571_p7)
}
  0x12   :  { %s672_s11 = smov 128   ;;  %s673_s12 = smov 8  }
  0x13   :  { %37 = dma.hbm_to_vmem [thread:$0]  %s820_s1, 256, %s32_s25, [#allocation6], %s672_s11, %s672_s11, %s673_s12  }
  0x14   :  { %s674_s15 = smov [#allocation2]   ;;  %s675_s17 = smov [#allocation7]  }
  0x15   :  { %s22_s16 = sshll.u32 %s674_s15, 4  ;;  %s45_s18 = sshll.u32 %s675_s17, 4  ;;  %s23_s16 = int_to_ptr.vmem [resolvable:$true] %s22_s16  ;;  %s46_s18 = int_to_ptr.vmem [resolvable:$true] %s45_s18 }
  0x16   :  { %s575_s21 = scalar_lea.hbm %s819_s0, 128 }
  0x17   :  { %p576_p8 = scmp.ne.s32.totalorder %s819_s0, %s575_s21  ;;  %p579_p9 = scmp.lt.u32.totalorder %s575_s21, %s819_s0 }
  0x19   :  { %p581_p10 = pnand %p579_p9, %p576_p8 }
  0x1b   :  { %584 = shalt.err (!%p581_p10)
}
  0x1c   :  { %s585_s1 = scalar_lea.vmem %s23_s16, 128  ;;  %p590_p12 = scmp.lt.s32.totalorder %s23_s16, %s23_s16 }
  0x1d   :  { %p586_p11 = scmp.ne.s32.totalorder %s23_s16, %s585_s1  ;;  %p591_p13 = scmp.lt.s32.totalorder %s585_s1, %s585_s1 }
  0x1f   :  { %p592_p0 = por %p591_p13, %p590_p12 }
  0x21   :  { %p593_p1 = pnand %p592_p0, %p586_p11 }
  0x23   :  { %596 = shalt.err (!%p593_p1)
}
  0x24   :  { %25 = dma.hbm_to_vmem [thread:$0]  %s819_s0, 128, %s23_s16, [#allocation3]  }
  0x25   :  { %s597_s30 = scalar_lea.hbm %s822_s3, 2048 }
  0x26   :  { %p598_p2 = scmp.ne.s32.totalorder %s822_s3, %s597_s30  ;;  %p601_p3 = scmp.lt.u32.totalorder %s597_s30, %s822_s3 }
  0x28   :  { %p603_p4 = pnand %p601_p3, %p598_p2 }
  0x2a   :  { %606 = shalt.err (!%p603_p4)
}
  0x2b   :  { %s607_s14 = scalar_lea.vmem %s46_s18, 2048  ;;  %p612_p6 = scmp.lt.s32.totalorder %s46_s18, %s46_s18 }
  0x2c   :  { %p608_p5 = scmp.ne.s32.totalorder %s46_s18, %s607_s14  ;;  %p613_p7 = scmp.lt.s32.totalorder %s607_s14, %s607_s14 }
  0x2e   :  { %p614_p8 = por %p613_p7, %p612_p6 }
  0x30   :  { %p615_p9 = pnand %p614_p8, %p608_p5 }
  0x32   :  { %618 = shalt.err (!%p615_p9)
}
  0x33   :  { %51 = dma.hbm_to_vmem [thread:$0]  %s822_s3, 2048, %s46_s18, [#allocation6], %s672_s11, %s672_s11, %s673_s12  }
  0x34   :  { %s676_s16 = smov [#allocation8]   ;;  %s619_s21 = scalar_lea.hbm %s824_s5, 2048 }
  0x35   :  { %s59_s17 = sshll.u32 %s676_s16, 4  ;;  %p620_p10 = scmp.ne.s32.totalorder %s824_s5, %s619_s21  ;;  %s60_s17 = int_to_ptr.vmem [resolvable:$true] %s59_s17 }
  0x36   :  { %p623_p11 = scmp.lt.u32.totalorder %s619_s21, %s824_s5 }
  0x38   :  { %p625_p12 = pnand %p623_p11, %p620_p10 }
  0x3a   :  { %628 = shalt.err (!%p625_p12)
}
  0x3b   :  { %s629_s1 = scalar_lea.vmem %s60_s17, 2048  ;;  %p634_p0 = scmp.lt.s32.totalorder %s60_s17, %s60_s17 }
  0x3c   :  { %p630_p13 = scmp.ne.s32.totalorder %s60_s17, %s629_s1  ;;  %p635_p1 = scmp.lt.s32.totalorder %s629_s1, %s629_s1 }
  0x3e   :  { %p636_p2 = por %p635_p1, %p634_p0 }
  0x40   :  { %p637_p3 = pnand %p636_p2, %p630_p13 }
  0x42   :  { %640 = shalt.err (!%p637_p3)
}
  0x43   :  { %65 = dma.hbm_to_vmem [thread:$0]  %s824_s5, 2048, %s60_s17, [#allocation9], %s672_s11, %s672_s11, %s673_s12  }
  0x44   :  { %663 = dma.done.wait [#allocation3], 128  }
  0x45   :  { %664 = vsyncadd [#allocation3], 4294967168 }
  0x46   :  { %665 = dma.done.wait [#allocation6], 2304  }
  0x47   :  { %666 = vsyncadd [#allocation6], 4294964992 }
  0x48   :  { %667 = dma.done.wait [#allocation9], 2048  }
  0x49   :  { %668 = vsyncadd [#allocation9], 4294965248  ;;  %v677_v0 = vmov 0.0|0.0   ;;  %vm678_vm0 = vmmov 0   ;;  %v679_v1 = vmov 0.0   ;;  %v81_v2 = vld [vmem:[#allocation5] sm:$0xff] }
  0x4a   :  { %488 = vmatprep.subr.bf16.mxu0 %v677_v0  ;;  %415 = vmatprep.mubr.msk.f32.mxu0 %vm678_vm0, %v679_v1  ;;  %v82_v3 = vld [vmem:[#allocation5 + $0x8] sm:$0xff]  ;;  %v165_v5 = vld [vmem:[#allocation7] sm:$0xff]  ;;  %v166_v6 = vld [vmem:[#allocation7 + $0x8] sm:$0xff]  ;;  %vm90_vm1 = vcmask 130048   ;;  %s680_s28 = smov [#allocation10]  }
  0x4b   :  { %491 = vmatprep.subr.bf16.mxu1 %v677_v0  ;;  %450 = vmatprep.mubr.msk.f32.mxu1 %vm678_vm0, %v679_v1  ;;  %v489_v4 = vpack.c.bf16 %v82_v3, %v81_v2  ;;  %v167_v7 = vld [vmem:[#allocation7 + $0x10] sm:$0xff]  ;;  %v492_v8 = vpack.c.bf16 %v166_v6, %v165_v5  ;;  %v168_v9 = vld [vmem:[#allocation7 + $0x18] sm:$0xff]  ;;  %v80_v10 = vld [vmem:[#allocation2] sm:$0xff]  ;;  %s359_s29 = sshll.u32 %s680_s28, 4  ;;  %s360_s29 = int_to_ptr.vmem [resolvable:$true] %s359_s29 }
  0x4c   :  { %v495_v11 = vpack.c.bf16 %v168_v9, %v167_v7  ;;  %v169_v12 = vld [vmem:[#allocation7 + $0x20] sm:$0xff]  ;;  %v170_v13 = vld [vmem:[#allocation7 + $0x28] sm:$0xff]  ;;  %v171_v15 = vld [vmem:[#allocation7 + $0x30] sm:$0xff]  ;;  %s641_s30 = scalar_lea.vmem %s360_s29, 128  ;;  %p646_p5 = scmp.lt.s32.totalorder %s360_s29, %s360_s29 }
  0x4d   :  { %490 = vmatpush3.bf16.msra.mxu0 %v489_v4  ;;  %493 = vmatpush3.bf16.msra.mxu1 %v492_v8  ;;  %v498_v14 = vpack.c.bf16 %v170_v13, %v169_v12  ;;  %v172_v16 = vld [vmem:[#allocation7 + $0x38] sm:$0xff]  ;;  %v173_v18 = vld [vmem:[#allocation7 + $0x40] sm:$0xff]  ;;  %v174_v19 = vld [vmem:[#allocation7 + $0x48] sm:$0xff]  ;;  %p642_p4 = scmp.ne.s32.totalorder %s360_s29, %s641_s30  ;;  %p647_p6 = scmp.lt.s32.totalorder %s641_s30, %s641_s30 }
  0x4e   :  { %515 = vmatprep.subr.bf16.mxu0 %v677_v0  ;;  %494 = vmatprep.subr.bf16.mxu1 %v677_v0  ;;  %v501_v17 = vpack.c.bf16 %v172_v16, %v171_v15  ;;  %v504_v20 = vpack.c.bf16 %v174_v19, %v173_v18  ;;  %v175_v21 = vld [vmem:[#allocation7 + $0x50] sm:$0xff]  ;;  %v176_v22 = vld [vmem:[#allocation7 + $0x58] sm:$0xff]  ;;  %v177_v24 = vld [vmem:[#allocation7 + $0x60] sm:$0xff] }
  0x4f   :  { %v507_v23 = vpack.c.bf16 %v176_v22, %v175_v21  ;;  %v178_v25 = vld [vmem:[#allocation7 + $0x68] sm:$0xff]  ;;  %v179_v27 = vld [vmem:[#allocation7 + $0x70] sm:$0xff]  ;;  %v180_v28 = vld [vmem:[#allocation7 + $0x78] sm:$0xff]  ;;  %p648_p7 = por %p647_p6, %p646_p5 }
  0x50   :  { %416 = vmatmul.mubr.msk.f32.vlgmr.msra.gmra.mrb[0].mxu0 %vm90_vm1, %v80_v10  ;;  %v510_v26 = vpack.c.bf16 %v178_v25, %v177_v24  ;;  %v513_v29 = vpack.c.bf16 %v180_v28, %v179_v27  ;;  %v259_v30 = vld [vmem:[#allocation8] sm:$0xff]  ;;  %v260_v31 = vld [vmem:[#allocation8 + $0x8] sm:$0xff]  ;;  %v261_v32 = vld [vmem:[#allocation8 + $0x10] sm:$0xff] }
  0x51   :  { %485 = vmatprep.mubr.msk.f32.mxu0 %vm678_vm0, %v679_v1  ;;  %496 = vmatpush3.bf16.msra.mxu1 %v495_v11  ;;  %v516_v33 = vpack.c.bf16 %v260_v31, %v259_v30  ;;  %v262_v34 = vld [vmem:[#allocation8 + $0x18] sm:$0xff]  ;;  %v263_v36 = vld [vmem:[#allocation8 + $0x20] sm:$0xff]  ;;  %v264_v37 = vld [vmem:[#allocation8 + $0x28] sm:$0xff]  ;;  %p649_p8 = pnand %p648_p7, %p642_p4 }
  0x52   :  { %497 = vmatprep.subr.bf16.mxu1 %v677_v0  ;;  %v519_v35 = vpack.c.bf16 %v262_v34, %v261_v32  ;;  %v522_v38 = vpack.c.bf16 %v264_v37, %v263_v36  ;;  %v265_v39 = vld [vmem:[#allocation8 + $0x30] sm:$0xff]  ;;  %v266_v40 = vld [vmem:[#allocation8 + $0x38] sm:$0xff]  ;;  %v267_v42 = vld [vmem:[#allocation8 + $0x40] sm:$0xff] }
  0x53   :  { %517 = vmatpush3.bf16.msra.mxu0 %v516_v33  ;;  %v525_v41 = vpack.c.bf16 %v266_v40, %v265_v39  ;;  %v268_v43 = vld [vmem:[#allocation8 + $0x48] sm:$0xff]  ;;  %v269_v50 = vld [vmem:[#allocation8 + $0x50] sm:$0xff]  ;;  %v270_v51 = vld [vmem:[#allocation8 + $0x58] sm:$0xff] }
  0x54   :  { %518 = vmatprep.subr.bf16.mxu0 %v677_v0  ;;  %v528_v44 = vpack.c.bf16 %v268_v43, %v267_v42  ;;  %v370_v45 = vld [vmem:[%s821_s2] ss:$0 sm:$0xff]  ;;  %v531_v52 = vpack.c.bf16 %v270_v51, %v269_v50  ;;  %v271_v53 = vld [vmem:[#allocation8 + $0x60] sm:$0xff]  ;;  %v273_v56 = vld [vmem:[#allocation8 + $0x70] sm:$0xff] }
  0x55   :  { %499 = vmatpush3.bf16.msra.mxu1 %v498_v14  ;;  %v272_v54 = vld [vmem:[#allocation8 + $0x68] sm:$0xff]  ;;  %v274_v57 = vld [vmem:[#allocation8 + $0x78] sm:$0xff] }
  0x56   :  { %500 = vmatprep.subr.bf16.mxu1 %v677_v0  ;;  %v534_v55 = vpack.c.bf16 %v272_v54, %v271_v53  ;;  %v537_v58 = vpack.c.bf16 %v274_v57, %v273_v56  ;;  %v372_v59 = vld [vmem:[%s823_s4] ss:$0 sm:$0xff] }
  0x57   :  { %520 = vmatpush3.bf16.msra.mxu0 %v519_v35  ;;  %v373_v1 = vld [vmem:[%s825_s6] ss:$0 sm:$0xff] }
  0x58   :  { %521 = vmatprep.subr.bf16.mxu0 %v677_v0 }
  0x59   :  { %502 = vmatpush3.bf16.msra.mxu1 %v501_v17 }
  0x5a   :  { %503 = vmatprep.subr.bf16.mxu1 %v677_v0 }
  0x5b   :  { %523 = vmatpush3.bf16.msra.mxu0 %v522_v38 }
  0x5c   :  { %524 = vmatprep.subr.bf16.mxu0 %v677_v0 }
  0x5d   :  { %505 = vmatpush3.bf16.msra.mxu1 %v504_v20 }
  0x5e   :  { %506 = vmatprep.subr.bf16.mxu1 %v677_v0 }
  0x5f   :  { %526 = vmatpush3.bf16.msra.mxu0 %v525_v41 }
  0x60   :  { %527 = vmatprep.subr.bf16.mxu0 %v677_v0 }
  0x61   :  { %508 = vmatpush3.bf16.msra.mxu1 %v507_v23 }
  0x62   :  { %509 = vmatprep.subr.bf16.mxu1 %v677_v0 }
  0x63   :  { %529 = vmatpush3.bf16.msra.mxu0 %v528_v44 }
  0x64   :  { %530 = vmatprep.subr.bf16.mxu0 %v677_v0 }
  0x65   :  { %511 = vmatpush3.bf16.msra.mxu1 %v510_v26 }
  0x66   :  { %512 = vmatprep.subr.bf16.mxu1 %v677_v0 }
  0x67   :  { %532 = vmatpush3.bf16.msra.mxu0 %v531_v52 }
  0x68   :  { %533 = vmatprep.subr.bf16.mxu0 %v677_v0 }
  0x69   :  { %514 = vmatpush3.bf16.msra.mxu1 %v513_v29 }
  0x6b   :  { %535 = vmatpush3.bf16.msra.mxu0 %v534_v55 }
  0x6c   :  { %536 = vmatprep.subr.bf16.mxu0 %v677_v0 }
  0x6f   :  { %538 = vmatpush3.bf16.msra.mxu0 %v537_v58 }
 0x123   :  { %v160_v46 = vpop.f32.mrb[0].mxu0 }
 0x124   :  { %v161_v47 = vadd.f32 %v370_v45, %v160_v46  ;;  %v417_v48 = vpop.f32.mrb[1].mxu0 }
 0x126   :  { %549 = vtanh.f32 %v161_v47 }
 0x130   :  { %v550_v49 = vpop.eup %549 }
 0x131   :  { %451 = vmatmul.mubr.f32.vlgmr.msra.gmra.mrb[0].mxu1 %v550_v49 }
 0x204   :  { %v254_v60 = vpop.f32.mrb[0].mxu1 }
 0x205   :  { %v255_v61 = vadd.f32 %v372_v59, %v254_v60  ;;  %v452_v62 = vpop.f32.mrb[1].mxu1 }
 0x207   :  { %551 = vtanh.f32 %v255_v61 }
 0x211   :  { %v552_v63 = vpop.eup %551 }
 0x212   :  { %486 = vmatmul.mubr.f32.vlgmr.msra.gmra.mrb[2].mxu0 %v552_v63 }
 0x2e5   :  { %v348_v2 = vpop.f32.mrb[2].mxu0 }
 0x2e6   :  { %v349_v3 = vadd.f32 %v373_v1, %v348_v2  ;;  %v487_v0 = vpop.f32.mrb[3].mxu0 }
 0x2e8   :  { %352 = vst [vmem:[#allocation10] sm:$0xff] %v349_v3 }
 0x2e9   :  { %652 = shalt.err (!%p649_p8)
}
 0x2ea   :  { %s653_s9 = scalar_lea.hbm %s826_s7, 128 }
 0x2eb   :  { %p654_p9 = scmp.ne.s32.totalorder %s826_s7, %s653_s9  ;;  %p657_p10 = scmp.lt.u32.totalorder %s653_s9, %s826_s7 }
 0x2ed   :  { %p659_p11 = pnand %p657_p10, %p654_p9 }
 0x2ef   :  { %662 = shalt.err (!%p659_p11)
}
 0x2f0   :  { %362 = dma.vmem_to_hbm [thread:$0]  %s360_s29, 128, %s826_s7, [#allocation4]  }
 0x2f1   :  { %669 = dma.done.wait [#allocation4], 128  }
 0x2f2   :  { %670 = vsyncadd [#allocation4], 4294967168 }
 0x2f3   :  { %366 = vsyncpa [#allocation3], 1 }
 0x2f4   :  { %367 = vsyncpa [#allocation6], 1 }
 0x2f5   :  { %368 = vsyncpa [#allocation9], 1 }
 0x2f6   :  { %369 = vsyncpa [#allocation4], 1 }

</bundles_post_ra>
